<compile_context>
chip_gen: v7x
topology: tpu7x:2x2x1
jax: 0.10.0
libtpu: 0.0.40
codegen_flags: <defaults>
</compile_context>

<pallas_src>
import functools
import math

import jax
import jax.numpy as jnp
from jax.experimental import pallas as pl
from jax.experimental.pallas import tpu as pltpu


def _conv2d_im2col_kernel(x_ref, w_ref, b_ref, o_ref, col_ref, *,
                          nb, n_slots, cin, wp, ho, kh_taps, kw_taps, k, kp):
    """One batch-block of `nb` images per grid step.

    x_ref  : (Nb, Cin_p, Lflat)     zero-padded NCHW planes, spatially flattened (bf16)
    w_ref  : (Cout, Kp)             tap-major flattened weights (bf16)
    b_ref  : (Cout, 1)              f32 bias
    o_ref  : (Nb, Cout, Ho*Wp)      lane-dense "extended width" output
    col_ref: (n_slots, Kp, Ho*Wp)   double-buffered im2col scratch (bf16)
    """
    mext = ho * wp
    row_len = mext + kw_taps - 1

    # Zero the contraction-pad rows: their weights are zero but the scratch is
    # uninitialized (avoid NaN/Inf * 0).  Deliberately not gated on
    # pl.program_id(0) == 0 — the grid axis is "parallel" and the second core of
    # a megacore part never sees program_id 0 for its private scratch.
    if kp > k:
        for s in range(n_slots):
            col_ref[s, k:, :] = jnp.zeros((kp - k, mext), col_ref.dtype)

    for n in range(nb):                              # static unroll over images
        slot = n % n_slots                           # alternate slots -> no WAR stall
        xf = x_ref[n]                                # (Cin_p, Lflat), one load per image
        for kh in range(kh_taps):
            # Hoisted per-kh row; per-kw shifts below are register-level lane
            # slices (XLU) instead of fresh unaligned loads.
            row = xf[:, kh * wp:kh * wp + row_len]   # (Cin_p, Mext + KW - 1)
            for kw in range(kw_taps):
                t = kh * kw_taps + kw
                col_ref[slot, t * cin:(t + 1) * cin, :] = row[:, kw:kw + mext]
        # One MXU matmul per image: (Cout, Kp) @ (Kp, Ho*Wp), f32 accumulate.
        acc = jnp.dot(w_ref[...], col_ref[slot],
                      preferred_element_type=jnp.float32)
        o_ref[n] = (acc + b_ref[...]).astype(o_ref.dtype)


def _vmem_capacity_bytes():
    """Per-core VMEM capacity; conservative 64 MiB (v7x) fallback."""
    try:
        info = pltpu.get_tpu_info()
        for name in ("vmem_capacity_bytes", "vmem_bytes", "vmem_size_bytes"):
            cap = getattr(info, name, None)
            if cap:
                return int(cap)
    except Exception:
        pass
    return 64 * 1024 * 1024


def conv2d_nchw_pallas(x_nchw, w_oihw, bias, padding,
                       compute_dtype=jnp.bfloat16):
    """F.conv2d(input, w, b, stride=1, padding=padding, dilation=1, groups=1).

    MXU operands are cast to `compute_dtype` (bf16 default); accumulation and the
    bias epilogue are f32; the output keeps the input dtype.
    """
    N, Cin, H, W = x_nchw.shape
    Cout, Cin_w, KH, KW = w_oihw.shape
    assert Cin == Cin_w
    ph, pw = padding
    Hp, Wp = H + 2 * ph, W + 2 * pw
    Ho, Wo = Hp - KH + 1, Wp - KW + 1
    Mext = Ho * Wp                                   # extended-width row length

    itemsize = jnp.dtype(compute_dtype).itemsize
    sub_mult = 8 * (4 // itemsize)                   # sublane rows/tile: f32->8, bf16->16
    Cin_p = ((Cin + 7) // 8) * 8                     # tap stores never straddle a tile
    K = KH * KW * Cin_p
    Kp = ((K + sub_mult - 1) // sub_mult) * sub_mult  # contraction pad for dtype packing

    # ---- glue (input stays NCHW): one zero-pad over (channel, H, W).  The extra
    # bottom row keeps every in-kernel tap slice of the flattened plane in bounds;
    # the padded channels are zero and carry zero weights. ----
    xp = jnp.pad(x_nchw, ((0, 0), (0, Cin_p - Cin), (ph, ph + 1), (pw, pw)))
    Lflat = (Hp + 1) * Wp
    x_flat = xp.reshape(N, Cin_p, Lflat).astype(compute_dtype)

    # Tap-major flattened weights: k = (kh*KW + kw)*Cin_p + ci, zero-padded to Kp.
    w_pad = jnp.pad(w_oihw, ((0, 0), (0, Cin_p - Cin), (0, 0), (0, 0)))
    w_flat = jnp.transpose(w_pad, (0, 2, 3, 1)).reshape(Cout, K)
    w_flat = jnp.pad(w_flat, ((0, 0), (0, Kp - K))).astype(compute_dtype)
    b2 = bias.reshape(Cout, 1).astype(jnp.float32)

    # ---- Nb / vmem_limit from the actual per-step footprint + device capacity. ----
    out_itemsize = jnp.dtype(x_nchw.dtype).itemsize
    bytes_x_img = Cin_p * Lflat * itemsize
    bytes_o_img = Cout * Mext * out_itemsize
    bytes_col = 2 * Kp * Mext * itemsize             # double-buffered im2col scratch
    bytes_wb = Cout * Kp * itemsize + Cout * 4

    capacity = _vmem_capacity_bytes()
    budget = int(0.7 * capacity)                     # leave compiler-scratch headroom

    def footprint(nb):
        # BlockSpec double-buffers every in/out block (x2); col scratch is ours.
        return 2 * nb * (bytes_x_img + bytes_o_img) + bytes_col + 2 * bytes_wb

    # Keep >= 2 grid steps (pipeline steady state + both megacore TCs busy);
    # cap Nb at 8 (static per-image unroll inside the kernel body).
    min_steps = 2 if N >= 2 else 1
    Nb = 1
    for cand in range(min(N, 8), 0, -1):
        if N % cand or N // cand < min_steps:
            continue
        if footprint(cand) <= budget:
            Nb = cand
            break
    n_slots = min(2, Nb)

    vmem_limit = int(min(capacity,
                         max(32 * 1024 * 1024, footprint(Nb) + 8 * 1024 * 1024)))

    kernel = functools.partial(
        _conv2d_im2col_kernel, nb=Nb, n_slots=n_slots, cin=Cin_p, wp=Wp, ho=Ho,
        kh_taps=KH, kw_taps=KW, k=K, kp=Kp)

    out_ext = pl.pallas_call(
        kernel,
        out_shape=jax.ShapeDtypeStruct((N, Cout, Mext), x_nchw.dtype),
        grid_spec=pltpu.PrefetchScalarGridSpec(
            num_scalar_prefetch=0,
            grid=(N // Nb,),
            in_specs=[
                pl.BlockSpec((Nb, Cin_p, Lflat), lambda i: (i, 0, 0)),
                pl.BlockSpec((Cout, Kp), lambda i: (0, 0)),
                pl.BlockSpec((Cout, 1), lambda i: (0, 0)),
            ],
            out_specs=pl.BlockSpec((Nb, Cout, Mext), lambda i: (i, 0, 0)),
            scratch_shapes=[pltpu.VMEM((n_slots, Kp, Mext), compute_dtype)],
        ),
        compiler_params=pltpu.CompilerParams(
            dimension_semantics=("parallel",),
            vmem_limit_bytes=vmem_limit),
    )(x_flat, w_flat, b2)

    # (N, Cout, Ho*Wp) -> NCHW: free reshape + drop the KW-1 invalid extended
    # columns.  No transpose needed.
    return out_ext.reshape(N, Cout, Ho, Wp)[:, :, :, :Wo]


class DynamicConv2d:
    """JAX port of the PyTorch DynamicConv2d (groups=1, stride=1, dilation=1)."""
    # TODO(synk): `self.idx` is Python-side mutable state; dynamic in_c/out_c
    # trigger a retrace per distinct channel count (fine eagerly, not under jit).

    def __init__(self, in_channels, out_channels, kernel_size, padding=1,
                 bias=True, n=1, key=None, compute_dtype=jnp.bfloat16):
        self.in_channels = in_channels
        self.out_channels = out_channels
        self.out_c = out_channels
        self.groups = 1
        self.n = n
        self.idx = 0
        self.stride = (1, 1)
        self.padding = (padding, padding)
        self.compute_dtype = compute_dtype

        # Deterministic init mimicking nn.Conv2d's default kaiming-uniform bounds.
        k_w, k_b = jax.random.split(key)
        fan_in = in_channels * kernel_size * kernel_size
        bound = 1.0 / math.sqrt(fan_in)
        self.weight = jax.random.uniform(
            k_w, (out_channels, in_channels, kernel_size, kernel_size),
            jnp.float32, -bound, bound)
        self.bias = (jax.random.uniform(k_b, (out_channels,), jnp.float32,
                                        -bound, bound) if bias else None)

    def _slice_params(self, in_c):
        if self.idx % 2 == 0:
            w = self.weight[:self.out_c, :in_c]
            b = self.bias[:self.out_c] if self.bias is not None else None
        else:
            w = self.weight[self.out_channels - self.out_c:,
                            self.in_channels - in_c:]
            b = (self.bias[self.out_channels - self.out_c:]
                 if self.bias is not None else None)
        return w, b

    def __call__(self, x_nchw):
        in_c = x_nchw.shape[1]
        w, b = self._slice_params(in_c)
        if self.n > 0:
            self.idx = (self.idx + 1) % self.n
        if b is None:
            b = jnp.zeros((w.shape[0],), jnp.float32)
        return conv2d_nchw_pallas(x_nchw, w, b, self.padding,
                                  compute_dtype=self.compute_dtype)


def _reference_conv(x, w, b, padding):
    ph, pw = padding
    out = jax.lax.conv_general_dilated(
        x, w, window_strides=(1, 1), padding=((ph, ph), (pw, pw)),
        dimension_numbers=('NCHW', 'OIHW', 'NCHW'))
    return out + b[None, :, None, None]


if __name__ == "__main__":
    key = jax.random.PRNGKey(0)
    k_mod, k_x1, k_x2 = jax.random.split(key, 3)

    # Full conv has 8 in / 8 out channels.  Case 1 feeds only 4 channels
    # (exercises the dynamic weight slicing + Cin padding); case 2 feeds all 8
    # channels with batch 4 (exercises Nb=2 per grid step + double-buffered col).
    mod = DynamicConv2d(in_channels=8, out_channels=8, kernel_size=3,
                        padding=1, bias=True, n=2, key=k_mod)
    cases = [
        jax.random.normal(k_x1, (2, 4, 16, 16), jnp.float32),   # NCHW
        jax.random.normal(k_x2, (4, 8, 16, 16), jnp.float32),   # NCHW
    ]

    for x in cases:
        for _ in range(2):                      # exercise both idx branches
            w_ref, b_ref = mod._slice_params(x.shape[1])
            y = jax.block_until_ready(mod(x))
            # Reference with the same bf16-rounded MXU operands (f32 accumulate).
            y_ref = _reference_conv(
                x.astype(jnp.bfloat16).astype(jnp.float32),
                w_ref.astype(jnp.bfloat16).astype(jnp.float32),
                b_ref, mod.padding)
            assert y.shape == (x.shape[0], 8, 16, 16), y.shape
            err = float(jnp.max(jnp.abs(y - y_ref)))
            assert jnp.allclose(y, y_ref, atol=2e-3, rtol=2e-3), err

    print("KERNEL_OK")
</pallas_src>

<mosaic_0001>
module attributes {stable_mosaic.version = 11 : i64} {
  func.func @_conv2d_im2col_kernel(%arg0: i32, %arg1: memref<1x8x342xbf16, #tpu.memory_space<vmem>>, %arg2: memref<8x80xbf16, #tpu.memory_space<vmem>>, %arg3: memref<8x1xf32, #tpu.memory_space<vmem>>, %arg4: memref<1x8x288xf32, #tpu.memory_space<vmem>>, %arg5: memref<1x80x288xbf16, #tpu.memory_space<vmem>>) attributes {dimension_semantics = [#tpu.dimension_semantics<parallel>], iteration_bounds = array<i64: 2>, scalar_prefetch = 0 : i64, scratch_operands = 1 : i64, tpu.core_type = #tpu.core_type<tc>, window_params = [{transform_indices = @transform_0, window_bounds = array<i64: 1, 8, 342>}, {pipeline_mode = #tpu.pipeline_mode<synchronous>, transform_indices = @transform_1, window_bounds = array<i64: 8, 80>}, {pipeline_mode = #tpu.pipeline_mode<synchronous>, transform_indices = @transform_2, window_bounds = array<i64: 8, 1>}, {transform_indices = @transform_3, window_bounds = array<i64: 1, 8, 288>}]} {
    %cst = arith.constant 0.000000e+00 : bf16
    %0 = vector.broadcast %cst : bf16 to vector<8x288xbf16>
    %c0 = arith.constant 0 : index
    %c72 = arith.constant 72 : index
    %c0_0 = arith.constant 0 : index
    %1 = vector.load %arg5[%c0, %c72, %c0_0] : memref<1x80x288xbf16, #tpu.memory_space<vmem>>, vector<1x8x288xbf16>
    %2 = vector.shape_cast %1 : vector<1x8x288xbf16> to vector<8x288xbf16>
    %3 = vector.shape_cast %0 : vector<8x288xbf16> to vector<1x8x288xbf16>
    tpu.vector_store %arg5[%c0, %c72, %c0_0], %3 {strides = array<i32>} : memref<1x80x288xbf16, #tpu.memory_space<vmem>>, vector<1x8x288xbf16>,
    %c0_1 = arith.constant 0 : index
    %c0_2 = arith.constant 0 : index
    %c0_3 = arith.constant 0 : index
    %4 = vector.load %arg1[%c0_1, %c0_2, %c0_3] : memref<1x8x342xbf16, #tpu.memory_space<vmem>>, vector<1x8x342xbf16>
    %5 = vector.shape_cast %4 : vector<1x8x342xbf16> to vector<8x342xbf16>
    %6 = vector.extract_strided_slice %5 {offsets = [0, 0], sizes = [8, 290], strides = [1, 1]} : vector<8x342xbf16> to vector<8x290xbf16>
    %7 = vector.extract_strided_slice %6 {offsets = [0, 0], sizes = [8, 288], strides = [1, 1]} : vector<8x290xbf16> to vector<8x288xbf16>
    %c0_4 = arith.constant 0 : index
    %c0_5 = arith.constant 0 : index
    %c0_6 = arith.constant 0 : index
    %8 = vector.load %arg5[%c0_4, %c0_5, %c0_6] : memref<1x80x288xbf16, #tpu.memory_space<vmem>>, vector<1x8x288xbf16>
    %9 = vector.shape_cast %8 : vector<1x8x288xbf16> to vector<8x288xbf16>
    %10 = vector.shape_cast %7 : vector<8x288xbf16> to vector<1x8x288xbf16>
    tpu.vector_store %arg5[%c0_4, %c0_5, %c0_6], %10 {strides = array<i32>} : memref<1x80x288xbf16, #tpu.memory_space<vmem>>, vector<1x8x288xbf16>,
    %11 = vector.extract_strided_slice %6 {offsets = [0, 1], sizes = [8, 288], strides = [1, 1]} : vector<8x290xbf16> to vector<8x288xbf16>
    %c0_7 = arith.constant 0 : index
    %c8 = arith.constant 8 : index
    %c0_8 = arith.constant 0 : index
    %12 = vector.load %arg5[%c0_7, %c8, %c0_8] : memref<1x80x288xbf16, #tpu.memory_space<vmem>>, vector<1x8x288xbf16>
    %13 = vector.shape_cast %12 : vector<1x8x288xbf16> to vector<8x288xbf16>
    %14 = vector.shape_cast %11 : vector<8x288xbf16> to vector<1x8x288xbf16>
    tpu.vector_store %arg5[%c0_7, %c8, %c0_8], %14 {strides = array<i32>} : memref<1x80x288xbf16, #tpu.memory_space<vmem>>, vector<1x8x288xbf16>,
    %15 = vector.extract_strided_slice %6 {offsets = [0, 2], sizes = [8, 288], strides = [1, 1]} : vector<8x290xbf16> to vector<8x288xbf16>
    %c0_9 = arith.constant 0 : index
    %c16 = arith.constant 16 : index
    %c0_10 = arith.constant 0 : index
    %16 = vector.load %arg5[%c0_9, %c16, %c0_10] : memref<1x80x288xbf16, #tpu.memory_space<vmem>>, vector<1x8x288xbf16>
    %17 = vector.shape_cast %16 : vector<1x8x288xbf16> to vector<8x288xbf16>
    %18 = vector.shape_cast %15 : vector<8x288xbf16> to vector<1x8x288xbf16>
    tpu.vector_store %arg5[%c0_9, %c16, %c0_10], %18 {strides = array<i32>} : memref<1x80x288xbf16, #tpu.memory_space<vmem>>, vector<1x8x288xbf16>,
    %19 = vector.extract_strided_slice %5 {offsets = [0, 18], sizes = [8, 290], strides = [1, 1]} : vector<8x342xbf16> to vector<8x290xbf16>
    %20 = vector.extract_strided_slice %19 {offsets = [0, 0], sizes = [8, 288], strides = [1, 1]} : vector<8x290xbf16> to vector<8x288xbf16>
    %c0_11 = arith.constant 0 : index
    %c24 = arith.constant 24 : index
    %c0_12 = arith.constant 0 : index
    %21 = vector.load %arg5[%c0_11, %c24, %c0_12] : memref<1x80x288xbf16, #tpu.memory_space<vmem>>, vector<1x8x288xbf16>
    %22 = vector.shape_cast %21 : vector<1x8x288xbf16> to vector<8x288xbf16>
    %23 = vector.shape_cast %20 : vector<8x288xbf16> to vector<1x8x288xbf16>
    tpu.vector_store %arg5[%c0_11, %c24, %c0_12], %23 {strides = array<i32>} : memref<1x80x288xbf16, #tpu.memory_space<vmem>>, vector<1x8x288xbf16>,
    %24 = vector.extract_strided_slice %19 {offsets = [0, 1], sizes = [8, 288], strides = [1, 1]} : vector<8x290xbf16> to vector<8x288xbf16>
    %c0_13 = arith.constant 0 : index
    %c32 = arith.constant 32 : index
    %c0_14 = arith.constant 0 : index
    %25 = vector.load %arg5[%c0_13, %c32, %c0_14] : memref<1x80x288xbf16, #tpu.memory_space<vmem>>, vector<1x8x288xbf16>
    %26 = vector.shape_cast %25 : vector<1x8x288xbf16> to vector<8x288xbf16>
    %27 = vector.shape_cast %24 : vector<8x288xbf16> to vector<1x8x288xbf16>
    tpu.vector_store %arg5[%c0_13, %c32, %c0_14], %27 {strides = array<i32>} : memref<1x80x288xbf16, #tpu.memory_space<vmem>>, vector<1x8x288xbf16>,
    %28 = vector.extract_strided_slice %19 {offsets = [0, 2], sizes = [8, 288], strides = [1, 1]} : vector<8x290xbf16> to vector<8x288xbf16>
    %c0_15 = arith.constant 0 : index
    %c40 = arith.constant 40 : index
    %c0_16 = arith.constant 0 : index
    %29 = vector.load %arg5[%c0_15, %c40, %c0_16] : memref<1x80x288xbf16, #tpu.memory_space<vmem>>, vector<1x8x288xbf16>
    %30 = vector.shape_cast %29 : vector<1x8x288xbf16> to vector<8x288xbf16>
    %31 = vector.shape_cast %28 : vector<8x288xbf16> to vector<1x8x288xbf16>
    tpu.vector_store %arg5[%c0_15, %c40, %c0_16], %31 {strides = array<i32>} : memref<1x80x288xbf16, #tpu.memory_space<vmem>>, vector<1x8x288xbf16>,
    %32 = vector.extract_strided_slice %5 {offsets = [0, 36], sizes = [8, 290], strides = [1, 1]} : vector<8x342xbf16> to vector<8x290xbf16>
    %33 = vector.extract_strided_slice %32 {offsets = [0, 0], sizes = [8, 288], strides = [1, 1]} : vector<8x290xbf16> to vector<8x288xbf16>
    %c0_17 = arith.constant 0 : index
    %c48 = arith.constant 48 : index
    %c0_18 = arith.constant 0 : index
    %34 = vector.load %arg5[%c0_17, %c48, %c0_18] : memref<1x80x288xbf16, #tpu.memory_space<vmem>>, vector<1x8x288xbf16>
    %35 = vector.shape_cast %34 : vector<1x8x288xbf16> to vector<8x288xbf16>
    %36 = vector.shape_cast %33 : vector<8x288xbf16> to vector<1x8x288xbf16>
    tpu.vector_store %arg5[%c0_17, %c48, %c0_18], %36 {strides = array<i32>} : memref<1x80x288xbf16, #tpu.memory_space<vmem>>, vector<1x8x288xbf16>,
    %37 = vector.extract_strided_slice %32 {offsets = [0, 1], sizes = [8, 288], strides = [1, 1]} : vector<8x290xbf16> to vector<8x288xbf16>
    %c0_19 = arith.constant 0 : index
    %c56 = arith.constant 56 : index
    %c0_20 = arith.constant 0 : index
    %38 = vector.load %arg5[%c0_19, %c56, %c0_20] : memref<1x80x288xbf16, #tpu.memory_space<vmem>>, vector<1x8x288xbf16>
    %39 = vector.shape_cast %38 : vector<1x8x288xbf16> to vector<8x288xbf16>
    %40 = vector.shape_cast %37 : vector<8x288xbf16> to vector<1x8x288xbf16>
    tpu.vector_store %arg5[%c0_19, %c56, %c0_20], %40 {strides = array<i32>} : memref<1x80x288xbf16, #tpu.memory_space<vmem>>, vector<1x8x288xbf16>,
    %41 = vector.extract_strided_slice %32 {offsets = [0, 2], sizes = [8, 288], strides = [1, 1]} : vector<8x290xbf16> to vector<8x288xbf16>
    %c0_21 = arith.constant 0 : index
    %c64 = arith.constant 64 : index
    %c0_22 = arith.constant 0 : index
    %42 = vector.load %arg5[%c0_21, %c64, %c0_22] : memref<1x80x288xbf16, #tpu.memory_space<vmem>>, vector<1x8x288xbf16>
    %43 = vector.shape_cast %42 : vector<1x8x288xbf16> to vector<8x288xbf16>
    %44 = vector.shape_cast %41 : vector<8x288xbf16> to vector<1x8x288xbf16>
    tpu.vector_store %arg5[%c0_21, %c64, %c0_22], %44 {strides = array<i32>} : memref<1x80x288xbf16, #tpu.memory_space<vmem>>, vector<1x8x288xbf16>,
    %c0_23 = arith.constant 0 : index
    %c0_24 = arith.constant 0 : index
    %45 = vector.load %arg2[%c0_23, %c0_24] : memref<8x80xbf16, #tpu.memory_space<vmem>>, vector<8x80xbf16>
    %c0_25 = arith.constant 0 : index
    %c0_26 = arith.constant 0 : index
    %c0_27 = arith.constant 0 : index
    %46 = vector.load %arg5[%c0_25, %c0_26, %c0_27] : memref<1x80x288xbf16, #tpu.memory_space<vmem>>, vector<1x80x288xbf16>
    %47 = vector.shape_cast %46 : vector<1x80x288xbf16> to vector<80x288xbf16>
    %cst_28 = arith.constant dense<0.000000e+00> : vector<8x288xf32>
    %48 = tpu.matmul %45, %47, %cst_28 {dimension_numbers = #tpu.dot_dimension_numbers<[1], [0], [0], [1], [0, 0, 1, 1], [], []>} : vector<8x80xbf16>, vector<80x288xbf16>, vector<8x288xf32> -> vector<8x288xf32>
    %c0_29 = arith.constant 0 : index
    %c0_30 = arith.constant 0 : index
    %49 = vector.load %arg3[%c0_29, %c0_30] : memref<8x1xf32, #tpu.memory_space<vmem>>, vector<8x1xf32>
    %50 = vector.broadcast %49 : vector<8x1xf32> to vector<8x288xf32>
    %51 = arith.addf %48, %50 : vector<8x288xf32>
    %c0_31 = arith.constant 0 : index
    %c0_32 = arith.constant 0 : index
    %c0_33 = arith.constant 0 : index
    %52 = vector.load %arg4[%c0_31, %c0_32, %c0_33] : memref<1x8x288xf32, #tpu.memory_space<vmem>>, vector<1x8x288xf32>
    %53 = vector.shape_cast %52 : vector<1x8x288xf32> to vector<8x288xf32>
    %54 = vector.shape_cast %51 : vector<8x288xf32> to vector<1x8x288xf32>
    tpu.vector_store %arg4[%c0_31, %c0_32, %c0_33], %54 {strides = array<i32>} : memref<1x8x288xf32, #tpu.memory_space<vmem>>, vector<1x8x288xf32>,
    return
  }
  func.func @transform_0(%arg0: i32) -> (i32, i32, i32) {
    %c0_i32 = arith.constant 0 : i32
    %c0_i32_0 = arith.constant 0 : i32
    %c0_i32_1 = arith.constant 0 : i32
    return %arg0, %c0_i32, %c0_i32_0 : i32, i32, i32
  }
  func.func @transform_1(%arg0: i32) -> (i32, i32) {
    %c0_i32 = arith.constant 0 : i32
    %c0_i32_0 = arith.constant 0 : i32
    %c0_i32_1 = arith.constant 0 : i32
    return %c0_i32, %c0_i32_0 : i32, i32
  }
  func.func @transform_2(%arg0: i32) -> (i32, i32) {
    %c0_i32 = arith.constant 0 : i32
    %c0_i32_0 = arith.constant 0 : i32
    %c0_i32_1 = arith.constant 0 : i32
    return %c0_i32, %c0_i32_0 : i32, i32
  }
  func.func @transform_3(%arg0: i32) -> (i32, i32, i32) {
    %c0_i32 = arith.constant 0 : i32
    %c0_i32_0 = arith.constant 0 : i32
    %c0_i32_1 = arith.constant 0 : i32
    return %arg0, %c0_i32, %c0_i32_0 : i32, i32, i32
  }
}

</mosaic_0001>

<bundles_post_ra>
// kernel: tpu_custom_call.1
= control target key start
LH: loop header
LB: loop body
LE: loop exit
PB: predicated region body
PF: predicated region fallthrough
CT: control target
= control target key end

     0   :  { %8 = vsyncpa [#allocation4], 0  ;;  %s939_s0 = inlined_call_operand.hbm [shape: bf16[2,8,342], index: 0, kind: input, shape index: {}]   ;;  %s940_s1 = inlined_call_operand.vmem [shape: bf16[8,80], index: 1, kind: input, shape index: {}]   ;;  %s941_s2 = inlined_call_operand.vmem [shape: f32[8,1], index: 2, kind: input, shape index: {}]   ;;  %s942_s3 = inlined_call_operand.hbm [shape: f32[2,8,288], index: 3, kind: output, shape index: {}]  }
   0x1   :  { %10 = vsyncpa [#allocation4 + $0x1], 0 }
   0x2   :  { %11 = vsyncpa [#allocation5], 0 }
   0x3   :  { %13 = vsyncpa [#allocation5 + $0x1], 0  ;;  %s755_s12 = smov 0   ;;  %s757_s13 = smov 0  }
   0x4   :  { %s759_s14 = smov 0   ;;  %s761_s15 = smov 0  }
   0x5 LB: > { %s776_s16 = sadd.s32 4294967295, %s720_s15   ;;  %s525_s17 = sadd.s32 4294967294, %s720_s15   ;;  %s720_s15 = sphi %s761_s15, %s956_s15   ;;  %s716_s14 = sphi %s759_s14, %s955_s14   ;;  %s712_s13 = sphi %s757_s13, %s954_s13   ;;  %s708_s12 = sphi %s755_s12, %s953_s12  }
   0x6   : > { %s780_s18 = sadd.s32 1, %s720_s15   ;;  %s26_s19 = sadd.s32 1, %s716_s14 }
   0x7   : > { %s23_s20 = ssub.s32 %s720_s15, %s780_s18  ;;  %p33_p0 = scmp.ne.s32.totalorder %s716_s14, %s712_s13 }
   0x8   : > { %p24_p1 = scmp.eq.s32.totalorder %s23_s20, 0  ;;  %p34_p2 = scmp.eq.s32.totalorder %s720_s15, 0 }
   0x9   : > { %p39_p3 = scmp.ne.s32.totalorder %s712_s13, %s708_s12  ;;  %p40_p4 = scmp.eq.s32.totalorder %s776_s16, 0 }
   0xa   : > { %s792_s21 = scalar_select %p24_p1, %s716_s14, %s26_s19  }
   0xb   : > { %p35_p5 = por %p34_p2, %p33_p0  ;;  %p794_p6 = por %p40_p4, %p39_p3 }
   0xc   : > { %p105_p7 = scmp.eq.s32.totalorder %s776_s16, 1  ;;  %p111_p8 = scmp.eq.s32.totalorder %s525_s17, 1 }
   0xd   : > { %p575_p10 = scmp.lt.s32.totalorder %s720_s15, 2  ;;  %s137_s25 = sand.u32 1, %s716_s14  }
   0xe   : > { %p801_p11 = por %p105_p7, %p33_p0  ;;  %p805_p12 = por %p111_p8, %p39_p3 }
   0xf   : > { %s559_s26 = smul.u32 192, %s720_s15  ;;  %p816_p13 = pnand %p575_p10, %p35_p5 }
  0x10   : > { %s945_s23 = scalar_select %p801_p11, 1, 0 }
  0x11   : > { %s946_s24 = scalar_select %p805_p12, 1, 0 }
  0x12   : > { %s558_s27 = smul.u32 12, %s137_s25  ;;  %s814_s30 = scalar_lea.hbm %s939_s0, %s559_s26 }
  0x13   : > { %s138_s7 = scalar_lea.sflag [#allocation4], %s137_s25  ;;  %s624_s8 = scalar_lea.hbm %s814_s30, 192 }
  0x14   : > { %s141_s5 = scalar_lea.vmem [#allocation3], %s558_s27  ;;  %p625_p2 = scmp.ne.s32.totalorder %s814_s30, %s624_s8 }
  0x15   : > { %s149_s6 = sshll.u32 %s141_s5, 4  ;;  %p626_p3 = pneg %p816_p13  ;;  %s821_s6 = int_to_ptr.vmem [resolvable:$true] %s149_s6 }
  0x16   : > { %s629_s11 = scalar_lea.hbm %s939_s0, 384  ;;  %p630_p7 = scmp.lt.u32.totalorder %s814_s30, %s939_s0 }
  0x17   : > { %p627_p4 = pnand %p626_p3, %p625_p2  ;;  %p631_p8 = scmp.lt.u32.totalorder %s629_s11, %s624_s8 }
  0x18   : > { %p633_p9 = scmp.lt.u32.totalorder %s624_s8, %s814_s30 }
  0x19   : > { %p628_p5 = pneg %p627_p4  ;;  %p632_p10 = por %p631_p8, %p630_p7 }
  0x1b   : > { %p634_p0 = por %p633_p9, %p632_p10 }
  0x1d   : > { %p635_p1 = pnand %p634_p0, %p628_p5 }
  0x1f   : > { %638 = shalt.err (!%p635_p1)
}
  0x20   : > { %s639_s20 = scalar_lea.vmem %s821_s6, 192  ;;  %s722_s25 = smov [#allocation3]  }
  0x21   : > { %p640_p2 = scmp.ne.s32.totalorder %s821_s6, %s639_s20  ;;  %s644_s26 = sshll.u32 %s722_s25, 4  ;;  %s645_s26 = int_to_ptr.vmem [resolvable:$false] %s644_s26 }
  0x22   : > { %s646_s27 = scalar_lea.vmem %s645_s26, 384  ;;  %p647_p11 = scmp.lt.s32.totalorder %s821_s6, %s645_s26 }
  0x23   : > { %p642_p4 = pnand %p640_p2, %p626_p3  ;;  %p648_p7 = scmp.lt.s32.totalorder %s646_s27, %s639_s20 }
  0x25   : > { %p643_p12 = pneg %p642_p4  ;;  %p649_p8 = por %p648_p7, %p647_p11 }
  0x27   : > { %p650_p9 = pnand %p649_p8, %p643_p12 }
  0x29   : > { %653 = shalt.err (!%p650_p9)
}
  0x2a   : > { %570 = dma.hbm_to_vmem [thread:$0]  (!%p816_p13), %s814_s30, 192, %s821_s6, %s138_s7  }
  0x2b   : > { %p948_p0 = scmp.lt.s32.totalorder %s720_s15, 3  ;;  %p949_p1 = scmp.ge.s32.totalorder %s720_s15, 1 }
  0x2d   : > { %p155_p3 = pnand %p949_p1, %p948_p0 }
  0x2e   : > { %s854_s28 = sand.u32 (!%p155_p3), 1, %s712_s13  }
  0x2f   : > { %158 = sbr.rel (%p155_p3) target bundleno = 459 (0x1cb), region = 32  ;;  %s161_s5 = scalar_lea.sflag (!%p155_p3), [#allocation4], %s854_s28 }
  0x30   : > { %s560_s29 = smul.u32 (!%p155_p3), 12, %s854_s28 }
  0x32   : > { %s164_s8 = scalar_lea.vmem (!%p155_p3), [#allocation3], %s560_s29 }
  0x36   : > { %699 = dma.done.wait (%p794_p6), %s161_s5, 192  }
  0x37   : > { %701 = vsyncadd (%p794_p6), %s161_s5, 4294967104  ;;  %vm190_vm0 = vcmask 261124   ;;  %v723_v0 = vmov 0   ;;  %vm207_vm1 = vcmask 257024   ;;  %v192_v1 = vld [vmem:[%s164_s8] sm:$0xff]  ;;  %v724_v3 = vmov 0.0  }
  0x38   : > { %188 = vst [vmem:[#allocation2 + $0x60] sm:$0xf0] %v723_v0  ;;  %189 = vst [vmem:[#allocation2 + $0x68] sm:$0xf0] %v723_v0  ;;  %387 = vmatprep.mubr.bf16.mxu0 %v723_v0  ;;  %620 = vset.pattern.permute.xlu0 %v723_v0  ;;  %v623_v2 = vld [vmem:[%s164_s8 + $0x8] ss:$0 sps:$4 sm:$0xff]   ;;  %v531_v4 = vcombine.high %v192_v1, %v192_v1  ;;  %v530_v5 = vcombine.low %v192_v1, %v192_v1 }
  0x39   : > { %191 = vst.msk [vmem:[#allocation2 + $0x70] sm:$0xf0] %vm190_vm0, %v723_v0  ;;  %544 = vmatprep.subr.bf16.mxu1 %v724_v3  ;;  %s725_s22 = smov 127   ;;  %s726_s30 = smov 126   ;;  %vm733_vm2 = vmmov 0   ;;  %v345_v6 = vld [vmem:[%s941_s2] sm:$0xff] }
  0x3a   : > { %208 = vst.msk [vmem:[#allocation2 + $0x10] sm:$0xf] %vm207_vm1, %v623_v2  ;;  %211 = vrot.lane.b32.xlu0 %v531_v4, %s725_s22  ;;  %206 = vst [vmem:[#allocation2 + $0x8] sm:$0xf] %v531_v4  ;;  %209 = vrot.lane.b32.xlu1 %v530_v5, %s725_s22  ;;  %s727_s4 = smov 110   ;;  %s728_s6 = smov 109  }
  0x3b   : > { %205 = vst [vmem:[#allocation2] sm:$0xf] %v530_v5  ;;  %s729_s7 = smov 108   ;;  %s730_s9 = smov 92   ;;  %554 = vmatprep.mubr.msk.bf16.mxu1 %vm733_vm2, %v724_v3  ;;  %vm215_vm3 = vcmask 1039360   ;;  %vm230_vm4 = vcmask 1031168  }
  0x3c   : > { %s731_s10 = smov 91   ;;  %s732_s11 = smov 90   ;;  %vm245_vm5 = vcmask 900096   ;;  %vm260_vm6 = vcmask 891904   ;;  %vm275_vm7 = vcmask 883712   ;;  %vm290_vm8 = vcmask 752640  }
  0x3d   : > { %vm305_vm9 = vcmask 744448   ;;  %vm320_vm10 = vcmask 736256   ;;  %v329_v62 = vld [vmem:[%s940_s1] sm:$0xf]  ;;  %vm351_vm11 = vcmask 654336   ;;  %s561_s26 = smul.u32 24, %s854_s28 }
  0x3e   : > { %213 = vrot.lane.b32.xlu0 %v623_v2, %s725_s22  ;;  %226 = vrot.lane.b32.xlu1 %v531_v4, %s726_s30  ;;  %vm438_vm12 = vcmask 261120   ;;  %s562_s27 = smul.u32 384, %s776_s16  ;;  %s441_s16 = scalar_lea.sflag [#allocation5], %s854_s28 }
  0x3f   : > { %s186_s29 = scalar_lea.vmem [#allocation6], %s561_s26  ;;  %p950_p11 = scmp.ne.s32.totalorder %s945_s23, 0 }
  0x40   : > { %s455_s5 = sshll.u32 %s186_s29, 4  ;;  %s897_s5 = int_to_ptr.vmem [resolvable:$true] %s455_s5 }
  0x42   : > { %228 = vrot.lane.b32.xlu0 %v623_v2, %s726_s30  ;;  %241 = vrot.lane.b32.xlu1 %v531_v4, %s727_s4 }
  0x46   : > { %243 = vrot.lane.b32.xlu0 %v623_v2, %s727_s4  ;;  %224 = vrot.lane.b32.xlu1 %v530_v5, %s726_s30  ;;  %s895_s30 = scalar_lea.hbm %s942_s3, %s562_s27 }
  0x4a   : > { %239 = vrot.lane.b32.xlu0 %v530_v5, %s727_s4  ;;  %256 = vrot.lane.b32.xlu1 %v531_v4, %s728_s6  ;;  %s654_s4 = scalar_lea.vmem %s897_s5, 384 }
  0x4b   : > { %p655_p6 = scmp.ne.s32.totalorder %s897_s5, %s654_s4 }
  0x4d   : > { %p656_p12 = pnand %p655_p6, %p950_p11 }
  0x4e   : > { %258 = vrot.lane.b32.xlu0 %v623_v2, %s728_s6  ;;  %271 = vrot.lane.b32.xlu1 %v531_v4, %s729_s7 }
  0x4f   : > { %p657_p13 = pneg %p656_p12 }
  0x52   : > { %273 = vrot.lane.b32.xlu0 %v623_v2, %s729_s7  ;;  %254 = vrot.lane.b32.xlu1 %v530_v5, %s728_s6  ;;  %s734_s6 = smov [#allocation6]  }
  0x56   : > { %269 = vrot.lane.b32.xlu0 %v530_v5, %s729_s7  ;;  %286 = vrot.lane.b32.xlu1 %v531_v4, %s730_s9  ;;  %s658_s7 = sshll.u32 %s734_s6, 4  ;;  %s659_s7 = int_to_ptr.vmem [resolvable:$false] %s658_s7 }
  0x57   : > { %p661_p5 = scmp.lt.s32.totalorder %s897_s5, %s659_s7 }
  0x5a   : > { %288 = vrot.lane.b32.xlu0 %v623_v2, %s730_s9  ;;  %301 = vrot.lane.b32.xlu1 %v531_v4, %s731_s10 }
  0x5e   : > { %303 = vrot.lane.b32.xlu0 %v623_v2, %s731_s10  ;;  %284 = vrot.lane.b32.xlu1 %v530_v5, %s730_s9  ;;  %s660_s9 = scalar_lea.vmem %s659_s7, 768 }
  0x5f   : > { %p662_p10 = scmp.lt.s32.totalorder %s660_s9, %s654_s4 }
  0x61   : > { %p663_p2 = por %p662_p10, %p661_p5 }
  0x62   : > { %299 = vrot.lane.b32.xlu0 %v530_v5, %s731_s10  ;;  %316 = vrot.lane.b32.xlu1 %v531_v4, %s732_s11 }
  0x63   : > { %p664_p4 = pnand %p663_p2, %p657_p13 }
  0x66   : > { %318 = vrot.lane.b32.xlu0 %v623_v2, %s732_s11  ;;  %314 = vrot.lane.b32.xlu1 %v530_v5, %s732_s11 }
  0x6a   : > { %348 = vperm.xlu0 %620, %v345_v6  }
  0xac   : > { %v212_v7 = vpop.permute.xlu0 %211  ;;  %v210_v8 = vpop.permute.xlu1 %209 }
  0xad   : > { %v216_v9 = vsel %vm215_vm3, %v210_v8, %v212_v7 }
  0xae   : > { %221 = vst [vmem:[#allocation2] sm:$0xf0] %v216_v9 }
  0xb0   : > { %v214_v10 = vpop.permute.xlu0 %213  ;;  %v227_v11 = vpop.permute.xlu1 %226 }
  0xb1   : > { %v217_v12 = vsel %vm215_vm3, %v212_v7, %v214_v10  ;;  %223 = vst.msk [vmem:[#allocation2 + $0x10] sm:$0xf0] %vm190_vm0, %v214_v10 }
  0xb2   : > { %222 = vst [vmem:[#allocation2 + $0x8] sm:$0xf0] %v217_v12 }
  0xb4   : > { %v229_v13 = vpop.permute.xlu0 %228  ;;  %v242_v14 = vpop.permute.xlu1 %241 }
  0xb5   : > { %v232_v15 = vsel %vm230_vm4, %v227_v11, %v229_v13  ;;  %238 = vst.msk [vmem:[#allocation2 + $0x28] sm:$0xf] %vm207_vm1, %v229_v13  ;;  %v330_v22 = vld [vmem:[#allocation2] sm:$0xff] }
  0xb6   : > { %237 = vst [vmem:[#allocation2 + $0x20] sm:$0xf] %v232_v15 }
  0xb8   : > { %v244_v16 = vpop.permute.xlu0 %243  ;;  %v225_v17 = vpop.permute.xlu1 %224  ;;  %v332_v18 = vld [vmem:[#allocation2 + $0x10] sm:$0xff] }
  0xb9   : > { %v247_v19 = vsel %vm245_vm5, %v242_v14, %v244_v16  ;;  %253 = vst.msk [vmem:[#allocation2 + $0x28] sm:$0xf0] %vm190_vm0, %v244_v16  ;;  %v231_v20 = vsel %vm230_vm4, %v225_v17, %v227_v11  ;;  %545 = vmatpush3.bf16.msra.mxu1 %v332_v18  ;;  %v331_v21 = vld [vmem:[#allocation2 + $0x8] sm:$0xff] }
  0xba   : > { %252 = vst [vmem:[#allocation2 + $0x20] sm:$0xf0] %v247_v19  ;;  %236 = vst [vmem:[#allocation2 + $0x18] sm:$0xf] %v231_v20  ;;  %355 = vmatprep.subr.bf16.mxu0 %v331_v21  ;;  %546 = vmatprep.subr.bf16.mxu1 %v724_v3 }
  0xbb   : > { %356 = vmatpush1.bf16.msra.mxu0 %v330_v22 }
  0xbc   : > { %v240_v23 = vpop.permute.xlu0 %239  ;;  %v257_v24 = vpop.permute.xlu1 %256 }
  0xbd   : > { %v246_v25 = vsel %vm245_vm5, %v240_v23, %v242_v14 }
  0xbe   : > { %251 = vst [vmem:[#allocation2 + $0x18] sm:$0xf0] %v246_v25 }
  0xc0   : > { %v259_v26 = vpop.permute.xlu0 %258  ;;  %v272_v27 = vpop.permute.xlu1 %271  ;;  %v335_v28 = vld [vmem:[#allocation2 + $0x28] sm:$0xff] }
  0xc1   : > { %v262_v29 = vsel %vm260_vm6, %v257_v24, %v259_v26  ;;  %268 = vst.msk [vmem:[#allocation2 + $0x40] sm:$0xf] %vm207_vm1, %v259_v26  ;;  %547 = vmatpush3.bf16.msra.mxu1 %v335_v28  ;;  %v334_v30 = vld [vmem:[#allocation2 + $0x20] sm:$0xff] }
  0xc2   : > { %267 = vst [vmem:[#allocation2 + $0x38] sm:$0xf] %v262_v29  ;;  %357 = vmatprep.subr.bf16.mxu0 %v334_v30  ;;  %548 = vmatprep.subr.bf16.mxu1 %v724_v3 }
  0xc4   : > { %v274_v31 = vpop.permute.xlu0 %273  ;;  %v255_v32 = vpop.permute.xlu1 %254 }
  0xc5   : > { %v277_v33 = vsel %vm275_vm7, %v272_v27, %v274_v31  ;;  %283 = vst.msk [vmem:[#allocation2 + $0x40] sm:$0xf0] %vm190_vm0, %v274_v31  ;;  %v261_v34 = vsel %vm260_vm6, %v255_v32, %v257_v24  ;;  %v333_v35 = vld [vmem:[#allocation2 + $0x18] sm:$0xff] }
  0xc6   : > { %282 = vst [vmem:[#allocation2 + $0x38] sm:$0xf0] %v277_v33  ;;  %266 = vst [vmem:[#allocation2 + $0x30] sm:$0xf] %v261_v34  ;;  %358 = vmatpush1.bf16.msra.mxu0 %v333_v35 }
  0xc8   : > { %v270_v36 = vpop.permute.xlu0 %269  ;;  %v287_v37 = vpop.permute.xlu1 %286 }
  0xc9   : > { %v276_v38 = vsel %vm275_vm7, %v270_v36, %v272_v27 }
  0xca   : > { %281 = vst [vmem:[#allocation2 + $0x30] sm:$0xf0] %v276_v38 }
  0xcc   : > { %v289_v39 = vpop.permute.xlu0 %288  ;;  %v302_v40 = vpop.permute.xlu1 %301  ;;  %v338_v41 = vld [vmem:[#allocation2 + $0x40] sm:$0xff] }
  0xcd   : > { %v292_v42 = vsel %vm290_vm8, %v287_v37, %v289_v39  ;;  %298 = vst.msk [vmem:[#allocation2 + $0x58] sm:$0xf] %vm207_vm1, %v289_v39  ;;  %549 = vmatpush3.bf16.msra.mxu1 %v338_v41  ;;  %v337_v43 = vld [vmem:[#allocation2 + $0x38] sm:$0xff] }
  0xce   : > { %297 = vst [vmem:[#allocation2 + $0x50] sm:$0xf] %v292_v42  ;;  %359 = vmatprep.subr.bf16.mxu0 %v337_v43  ;;  %550 = vmatprep.subr.bf16.mxu1 %v724_v3 }
  0xd0   : > { %v304_v44 = vpop.permute.xlu0 %303  ;;  %v285_v45 = vpop.permute.xlu1 %284 }
  0xd1   : > { %v307_v46 = vsel %vm305_vm9, %v302_v40, %v304_v44  ;;  %313 = vst.msk [vmem:[#allocation2 + $0x58] sm:$0xf0] %vm190_vm0, %v304_v44  ;;  %v291_v47 = vsel %vm290_vm8, %v285_v45, %v287_v37  ;;  %v336_v48 = vld [vmem:[#allocation2 + $0x30] sm:$0xff] }
  0xd2   : > { %312 = vst [vmem:[#allocation2 + $0x50] sm:$0xf0] %v307_v46  ;;  %296 = vst [vmem:[#allocation2 + $0x48] sm:$0xf] %v291_v47  ;;  %360 = vmatpush1.bf16.msra.mxu0 %v336_v48 }
  0xd4   : > { %v300_v49 = vpop.permute.xlu0 %299  ;;  %v317_v50 = vpop.permute.xlu1 %316 }
  0xd5   : > { %v306_v51 = vsel %vm305_vm9, %v300_v49, %v302_v40 }
  0xd6   : > { %311 = vst [vmem:[#allocation2 + $0x48] sm:$0xf0] %v306_v51 }
  0xd8   : > { %v319_v52 = vpop.permute.xlu0 %318  ;;  %v315_v53 = vpop.permute.xlu1 %314  ;;  %v341_v54 = vld [vmem:[#allocation2 + $0x58] sm:$0xff] }
  0xd9   : > { %v322_v55 = vsel %vm320_vm10, %v317_v50, %v319_v52  ;;  %328 = vst.msk [vmem:[#allocation2 + $0x70] sm:$0xf] %vm207_vm1, %v319_v52  ;;  %v321_v56 = vsel %vm320_vm10, %v315_v53, %v317_v50  ;;  %551 = vmatpush3.bf16.msra.mxu1 %v341_v54  ;;  %v340_v57 = vld [vmem:[#allocation2 + $0x50] sm:$0xff] }
  0xda   : > { %327 = vst [vmem:[#allocation2 + $0x68] sm:$0xf] %v322_v55  ;;  %326 = vst [vmem:[#allocation2 + $0x60] sm:$0xf] %v321_v56  ;;  %361 = vmatprep.subr.bf16.mxu0 %v340_v57  ;;  %552 = vmatprep.subr.bf16.mxu1 %v724_v3 }
  0xdd   : > { %v339_v58 = vld [vmem:[#allocation2 + $0x48] sm:$0xff] }
  0xde   : > { %362 = vmatpush1.bf16.msra.mxu0 %v339_v58 }
  0xe0   : > { %v344_v59 = vld [vmem:[#allocation2 + $0x70] sm:$0xff] }
  0xe1   : > { %553 = vmatpush3.bf16.msra.mxu1 %v344_v59  ;;  %v343_v60 = vld [vmem:[#allocation2 + $0x68] sm:$0xff]  ;;  %v342_v61 = vld [vmem:[#allocation2 + $0x60] sm:$0xff] }
  0xe2   : > { %363 = vmatprep.subr.bf16.mxu0 %v343_v60 }
  0xe3   : > { %364 = vmatpush1.bf16.msra.mxu0 %v342_v61 }
  0xe4   : > { %555 = vmatmul.mubr.msk.bf16.vlgmr.msra.gmra.mrb[0].mxu1 %vm351_vm11, %v329_v62 }
  0xe6   : > { %533 = vmatmul.mubr.msk.bf16.vlgmr.msra.gmra.mrb[0].mxu0 %vm351_vm11, %v329_v62 }
  0xe9   : > { %v349_v63 = vpop.permute.xlu0 %348 }
 0x1b7   : > { %v430_v0 = vpop.f32.mrb[0].mxu1 }
 0x1b8   : > { %v556_v1 = vpop.f32.mrb[1].mxu1  ;;  %v431_v2 = vadd.f32 %v430_v0, %v349_v63 }
 0x1b9   : > { %v389_v3 = vpop.f32.mrb[0].mxu0  ;;  %v433_v4 = vpop.f32.mrb[2].mxu1 }
 0x1ba   : > { %v390_v5 = vadd.f32 %v389_v3, %v349_v63  ;;  %v391_v6 = vpop.f32.mrb[1].mxu0  ;;  %v557_v7 = vpop.f32.mrb[3].mxu1  ;;  %439 = vst.msk [vmem:[%s186_s29 + $0x10] sm:$0xff] %vm438_vm12, %v431_v2 }
 0x1bb   : > { %v392_v8 = vadd.f32 %v391_v6, %v349_v63  ;;  %v393_v9 = vpop.f32.mrb[2].mxu0 }
 0x1bc   : > { %436 = vst [vmem:[%s186_s29] sm:$0xff] %v390_v5  ;;  %v394_v10 = vpop.f32.mrb[3].mxu0 }
 0x1bd   : > { %437 = vst [vmem:[%s186_s29 + $0x8] sm:$0xff] %v392_v8 }
 0x1be   : > { %667 = shalt.err (!%p664_p4)
}
 0x1bf   : > { %s668_s28 = scalar_lea.hbm %s895_s30, 384  ;;  %s672_s17 = scalar_lea.hbm %s942_s3, 768 }
 0x1c0   : > { %p669_p7 = scmp.ne.s32.totalorder %s895_s30, %s668_s28  ;;  %p673_p0 = scmp.lt.u32.totalorder %s895_s30, %s942_s3 }
 0x1c1   : > { %p674_p1 = scmp.lt.u32.totalorder %s672_s17, %s668_s28  ;;  %p676_p6 = scmp.lt.u32.totalorder %s668_s28, %s895_s30 }
 0x1c2   : > { %p670_p8 = pnand %p669_p7, %p950_p11 }
 0x1c3   : > { %p675_p3 = por %p674_p1, %p673_p0 }
 0x1c4   : > { %p671_p9 = pneg %p670_p8 }
 0x1c5   : > { %p677_p12 = por %p676_p6, %p675_p3 }
 0x1c7   : > { %p678_p13 = pnand %p677_p12, %p671_p9 }
 0x1c9   : > { %681 = shalt.err (!%p678_p13)
}
 0x1ca   : > { %565 = dma.vmem_to_hbm [thread:$0]  (%p950_p11), %s897_s5, 384, %s895_s30, %s441_s16  }
 0x1cb PF: > { %s467_s25 = sand.u32 1, %s708_s12   ;;  %p951_p5 = scmp.ne.s32.totalorder %s946_s24, 0 }
 0x1cc   : > { %p952_p10 = scmp.ge.s32.totalorder %s720_s15, 2  ;;  %s468_s26 = scalar_lea.sflag [#allocation5], %s467_s25 }
 0x1ce   : > { %p572_p2 = pnand %p952_p10, %p951_p5 }
 0x1d0   : > { %703 = dma.done.wait (!%p572_p2), %s468_s26, 384  }
 0x1d1   : > { %705 = vsyncadd (!%p572_p2), %s468_s26, 4294966912  ;;  %p16_p4 = scmp.ge.s32.totalorder %s780_s18, 4   ;;  %s953_s12 = smov %s712_s13 }
 0x1d2   : > { %s954_s13 = smov %s716_s14  ;;  %s955_s14 = smov %s792_s21 }
 0x1d3   : > { %s956_s15 = smov %s780_s18  ;;  %18 = sbr.rel (!%p16_p4) target bundleno = 5 (0x5), region = 77 }
 0x1da   :  { %473 = vsyncpa [#allocation4], 1 }
 0x1db   :  { %475 = vsyncpa [#allocation4 + $0x1], 1 }
 0x1dc   :  { %476 = vsyncpa [#allocation5], 1 }
 0x1dd   :  { %478 = vsyncpa [#allocation5 + $0x1], 1 }

</bundles_post_ra>
